<compile_context>
chip_gen: v7x
topology: tpu7x:2x2x1
jax: 0.10.0
libtpu: 0.0.40
codegen_flags: <defaults>
</compile_context>

<pallas_src>
import jax
import jax.numpy as jnp
from jax.experimental import pallas as pl
from jax.experimental.pallas import tpu as pltpu


def generator_z_kernel(x_ref, w_ref, b_ref, o_ref):
    # Single GEMM: (tb, xd) @ (xd, 2*zd), accumulate in f32 on the MXU.
    acc = jnp.dot(x_ref[...], w_ref[...], preferred_element_type=jnp.float32)
    # Bias add in f32 (b_ref is kept f32 even when operands are bf16).
    o_ref[...] = (acc + b_ref[...]).astype(o_ref.dtype)


def _pick_tb(B, sub, max_tb=1024):
    """Pick a batch tile: one step for small B, else the largest divisor of B
    that is <= max_tb and a multiple of the sublane tile."""
    if B <= max_tb:
        return B
    start = (max_tb // sub) * sub
    for t in range(start, 0, -sub):
        if B % t == 0:
            return t
    return B  # fall back to a single (large) step


def generator_z_forward(x, w1, w2, w3, b3, *, tb=None, compute_dtype=jnp.float32):
    """x: [B, xd]; w1: [xd, 8zd]; w2: [8zd, 4zd]; w3: [4zd, 2zd]; b3: [1, 2zd].

    Weights are stored as [in, out] (transposed from PyTorch's [out, in]).
    The activation-free chain is collapsed to one [xd, 2zd] weight on the host
    side (pure affine => mathematically identical to the three Linears).
    """
    B, xd = x.shape
    d3 = w3.shape[1]

    # Collapse the chain once (f32 for accuracy), then cast operands.
    w = (w1.astype(jnp.float32) @ w2.astype(jnp.float32)) @ w3.astype(jnp.float32)
    w = w.astype(compute_dtype)
    xc = x.astype(compute_dtype)
    b = b3.astype(jnp.float32).reshape(1, d3)   # bias stays f32

    sub = 16 if compute_dtype == jnp.bfloat16 else 8
    if tb is None:
        tb = _pick_tb(B, sub)
    assert B % tb == 0, f"batch {B} must be divisible by tile {tb}"
    assert tb == B or tb % sub == 0, f"tile {tb} must be a multiple of {sub}"

    grid = (B // tb,)
    return pl.pallas_call(
        generator_z_kernel,
        out_shape=jax.ShapeDtypeStruct((B, d3), jnp.float32),
        grid_spec=pltpu.PrefetchScalarGridSpec(
            num_scalar_prefetch=0,
            grid=grid,
            in_specs=[
                pl.BlockSpec((tb, xd), lambda i: (i, 0)),  # x: streamed over batch
                pl.BlockSpec((xd, d3), lambda i: (0, 0)),  # collapsed weight (resident)
                pl.BlockSpec((1, d3), lambda i: (0, 0)),   # bias (resident, f32)
            ],
            # d3 = 2*zd = 32 < 128 lanes -> masked output stores; acceptable once
            # tb is large (sublane dim dense).  TODO(synk): if fused into a larger
            # pipeline, keep the output staged as a lane-dense slab instead.
            out_specs=pl.BlockSpec((tb, d3), lambda i: (i, 0)),
        ),
        compiler_params=pltpu.CompilerParams(
            dimension_semantics=("parallel",),  # >=2 grid steps -> both v7x TCs active
        ),
    )(xc, w, b)


if __name__ == "__main__":
    zd, xd = 16, 256
    B = 256  # 2 grid steps of 128 rows each

    key = jax.random.PRNGKey(0)
    kx, k1, k2, k3, kb = jax.random.split(key, 5)

    # Deterministic synthetic parameters (nn.Linear weights stored as [in, out]).
    x = jax.random.normal(kx, (B, xd), dtype=jnp.float32)
    w1 = jax.random.normal(k1, (xd, zd * 8), dtype=jnp.float32) * 0.05   # Linear(256, 128, bias=False)
    w2 = jax.random.normal(k2, (zd * 8, zd * 4), dtype=jnp.float32) * 0.05  # Linear(128, 64, bias=False)
    w3 = jax.random.normal(k3, (zd * 4, zd * 2), dtype=jnp.float32) * 0.05  # Linear(64, 32, bias=True)
    b3 = jax.random.normal(kb, (1, zd * 2), dtype=jnp.float32) * 0.05

    # --- f32 operands: exact-semantics check vs the chained reference ---
    out = generator_z_forward(x, w1, w2, w3, b3, tb=128)
    out = jax.block_until_ready(out)
    ref = ((x @ w1) @ w2) @ w3 + b3
    assert out.shape == (B, zd * 2)
    assert jnp.allclose(out, ref, atol=1e-4, rtol=1e-4), "f32 mismatch vs reference"

    # --- bf16 operands, f32 accumulate (v5e/v6e/v7x fast path) ---
    out_bf16 = generator_z_forward(x, w1, w2, w3, b3, tb=128,
                                   compute_dtype=jnp.bfloat16)
    out_bf16 = jax.block_until_ready(out_bf16)
    w_c = ((w1 @ w2) @ w3).astype(jnp.bfloat16).astype(jnp.float32)
    ref_bf16 = x.astype(jnp.bfloat16).astype(jnp.float32) @ w_c + b3
    assert jnp.allclose(out_bf16, ref_bf16, atol=1e-3, rtol=1e-2), "bf16 mismatch"

    print("KERNEL_OK")
</pallas_src>

<mosaic_0001>
module attributes {stable_mosaic.version = 11 : i64} {
  func.func @generator_z_kernel(%arg0: i32, %arg1: memref<128x256xf32, #tpu.memory_space<vmem>>, %arg2: memref<256x32xf32, #tpu.memory_space<vmem>>, %arg3: memref<1x32xf32, #tpu.memory_space<vmem>>, %arg4: memref<128x32xf32, #tpu.memory_space<vmem>>) attributes {dimension_semantics = [#tpu.dimension_semantics<parallel>], iteration_bounds = array<i64: 2>, scalar_prefetch = 0 : i64, scratch_operands = 0 : i64, tpu.core_type = #tpu.core_type<tc>, window_params = [{transform_indices = @transform_0, window_bounds = array<i64: 128, 256>}, {pipeline_mode = #tpu.pipeline_mode<synchronous>, transform_indices = @transform_1, window_bounds = array<i64: 256, 32>}, {pipeline_mode = #tpu.pipeline_mode<synchronous>, transform_indices = @transform_2, window_bounds = array<i64: 1, 32>}, {transform_indices = @transform_3, window_bounds = array<i64: 128, 32>}]} {
    %c0 = arith.constant 0 : index
    %c0_0 = arith.constant 0 : index
    %0 = vector.load %arg1[%c0, %c0_0] : memref<128x256xf32, #tpu.memory_space<vmem>>, vector<128x256xf32>
    %c0_1 = arith.constant 0 : index
    %c0_2 = arith.constant 0 : index
    %1 = vector.load %arg2[%c0_1, %c0_2] : memref<256x32xf32, #tpu.memory_space<vmem>>, vector<256x32xf32>
    %cst = arith.constant dense<0.000000e+00> : vector<128x32xf32>
    %2 = tpu.matmul %0, %1, %cst {dimension_numbers = #tpu.dot_dimension_numbers<[1], [0], [0], [1], [0, 0, 1, 1], [], []>} : vector<128x256xf32>, vector<256x32xf32>, vector<128x32xf32> -> vector<128x32xf32>
    %c0_3 = arith.constant 0 : index
    %c0_4 = arith.constant 0 : index
    %3 = vector.load %arg3[%c0_3, %c0_4] : memref<1x32xf32, #tpu.memory_space<vmem>>, vector<1x32xf32>
    %4 = vector.broadcast %3 : vector<1x32xf32> to vector<128x32xf32>
    %5 = arith.addf %2, %4 : vector<128x32xf32>
    %c0_5 = arith.constant 0 : index
    %c0_6 = arith.constant 0 : index
    %6 = vector.load %arg4[%c0_5, %c0_6] : memref<128x32xf32, #tpu.memory_space<vmem>>, vector<128x32xf32>
    tpu.vector_store %arg4[%c0_5, %c0_6], %5 {strides = array<i32>} : memref<128x32xf32, #tpu.memory_space<vmem>>, vector<128x32xf32>,
    return
  }
  func.func @transform_0(%arg0: i32) -> (i32, i32) {
    %c0_i32 = arith.constant 0 : i32
    %c0_i32_0 = arith.constant 0 : i32
    return %arg0, %c0_i32 : i32, i32
  }
  func.func @transform_1(%arg0: i32) -> (i32, i32) {
    %c0_i32 = arith.constant 0 : i32
    %c0_i32_0 = arith.constant 0 : i32
    %c0_i32_1 = arith.constant 0 : i32
    return %c0_i32, %c0_i32_0 : i32, i32
  }
  func.func @transform_2(%arg0: i32) -> (i32, i32) {
    %c0_i32 = arith.constant 0 : i32
    %c0_i32_0 = arith.constant 0 : i32
    %c0_i32_1 = arith.constant 0 : i32
    return %c0_i32, %c0_i32_0 : i32, i32
  }
  func.func @transform_3(%arg0: i32) -> (i32, i32) {
    %c0_i32 = arith.constant 0 : i32
    %c0_i32_0 = arith.constant 0 : i32
    return %arg0, %c0_i32 : i32, i32
  }
}

</mosaic_0001>

<bundles_post_ra>
// kernel: tpu_custom_call.1
= control target key start
LH: loop header
LB: loop body
LE: loop exit
PB: predicated region body
PF: predicated region fallthrough
CT: control target
= control target key end

     0   :  { %8 = vsyncpa [#allocation3], 0  ;;  %s1061_s0 = inlined_call_operand.hbm [shape: f32[256,256], index: 0, kind: input, shape index: {}]   ;;  %s1062_s1 = inlined_call_operand.vmem [shape: f32[256,32], index: 1, kind: input, shape index: {}]   ;;  %s1063_s2 = inlined_call_operand.vmem [shape: f32[1,32], index: 2, kind: input, shape index: {}]   ;;  %s1064_s3 = inlined_call_operand.vmem [shape: f32[256,32], index: 3, kind: output, shape index: {}]  }
   0x1   :  { %10 = vsyncpa [#allocation3 + $0x1], 0  ;;  %s769_s12 = smov 0   ;;  %s771_s13 = smov 0  }
   0x2   :  { %s773_s14 = smov 0   ;;  %s775_s15 = smov 0  }
   0x3 LB: > { %s494_s16 = sadd.s32 4294967295, %s744_s15   ;;  %s789_s17 = sadd.s32 1, %s744_s15   ;;  %s744_s15 = sphi %s775_s15, %s1071_s15   ;;  %s740_s14 = sphi %s773_s14, %s1070_s14   ;;  %s736_s13 = sphi %s771_s13, %s1069_s13   ;;  %s732_s12 = sphi %s769_s12, %s1068_s12  }
   0x4   : > { %s20_s18 = ssub.s32 %s744_s15, %s789_s17  ;;  %s23_s19 = sadd.s32 1, %s740_s14 }
   0x5   : > { %p21_p0 = scmp.eq.s32.totalorder %s20_s18, 0  ;;  %p30_p1 = scmp.ne.s32.totalorder %s740_s14, %s736_s13 }
   0x6   : > { %p31_p2 = scmp.eq.s32.totalorder %s744_s15, 0  ;;  %p36_p3 = scmp.ne.s32.totalorder %s736_s13, %s732_s12 }
   0x7   : > { %s799_s20 = scalar_select %p21_p0, %s740_s14, %s23_s19  }
   0x8   : > { %p32_p4 = por %p31_p2, %p30_p1  ;;  %p37_p5 = scmp.eq.s32.totalorder %s494_s16, 0 }
   0x9   : > { %p645_p6 = scmp.lt.s32.totalorder %s744_s15, 2  ;;  %s134_s22 = sand.u32 1, %s740_s14  }
   0xa   : > { %p804_p7 = por %p37_p5, %p36_p3  ;;  %s498_s23 = sshll.u32 %s134_s22, 8 }
   0xb   : > { %s510_s24 = sshll.u32 %s744_s15, 12  ;;  %s138_s28 = scalar_lea.vmem [#allocation2], %s498_s23 }
   0xc   : > { %s813_s27 = scalar_lea.hbm %s1061_s0, %s510_s24  ;;  %s146_s29 = sshll.u32 %s138_s28, 4  ;;  %s815_s29 = int_to_ptr.vmem [resolvable:$true] %s146_s29 }
   0xd   : > { %p817_p8 = pnand %p645_p6, %p32_p4  ;;  %s822_s4 = scalar_lea.sflag [#allocation3], %s134_s22 }
   0xe   : > { %s680_s5 = scalar_lea.hbm %s813_s27, 4096  ;;  %s685_s8 = scalar_lea.hbm %s1061_s0, 8192 }
   0xf   : > { %p681_p10 = scmp.ne.s32.totalorder %s813_s27, %s680_s5  ;;  %p682_p11 = pneg %p817_p8 }
  0x10   : > { %p686_p0 = scmp.lt.u32.totalorder %s813_s27, %s1061_s0  ;;  %p687_p1 = scmp.lt.u32.totalorder %s685_s8, %s680_s5 }
  0x11   : > { %p683_p12 = pnand %p682_p11, %p681_p10  ;;  %p689_p3 = scmp.lt.u32.totalorder %s680_s5, %s813_s27 }
  0x12   : > { %p688_p2 = por %p687_p1, %p686_p0 }
  0x13   : > { %p684_p13 = pneg %p683_p12 }
  0x14   : > { %p690_p4 = por %p689_p3, %p688_p2 }
  0x16   : > { %p691_p5 = pnand %p690_p4, %p684_p13 }
  0x18   : > { %694 = shalt.err (!%p691_p5)
}
  0x19   : > { %s695_s11 = scalar_lea.vmem %s815_s29, 4096  ;;  %s746_s12 = smov [#allocation2]  }
  0x1a   : > { %p696_p6 = scmp.ne.s32.totalorder %s815_s29, %s695_s11  ;;  %s700_s18 = sshll.u32 %s746_s12, 4  ;;  %s701_s18 = int_to_ptr.vmem [resolvable:$false] %s700_s18 }
  0x1b   : > { %s702_s19 = scalar_lea.vmem %s701_s18, 8192  ;;  %p703_p9 = scmp.lt.s32.totalorder %s815_s29, %s701_s18 }
  0x1c   : > { %p698_p10 = pnand %p696_p6, %p682_p11  ;;  %p704_p0 = scmp.lt.s32.totalorder %s702_s19, %s695_s11 }
  0x1e   : > { %p699_p12 = pneg %p698_p10  ;;  %p705_p1 = por %p704_p0, %p703_p9 }
  0x20   : > { %p706_p2 = pnand %p705_p1, %p699_p12 }
  0x22   : > { %709 = shalt.err (!%p706_p2)
}
  0x23   : > { %s747_s22 = smov 256   ;;  %s748_s23 = smov 16  }
  0x24   : > { %644 = dma.hbm_to_vmem [thread:$0]  (!%p817_p8), %s813_s27, 4096, %s815_s29, %s822_s4, %s747_s22, %s747_s22, %s748_s23  }
  0x25   : > { %p154_p11 = scmp.lt.s32.totalorder %s744_s15, 3  ;;  %p1067_p13 = scmp.ge.s32.totalorder %s744_s15, 1 }
  0x27   : > { %p155_p3 = pnand %p1067_p13, %p154_p11 }
  0x28   : > { %s160_s24 = sand.u32 (!%p155_p3), 1, %s736_s13  }
  0x29   : > { %158 = sbr.rel (%p155_p3) target bundleno = 330 (0x14a), region = 32  ;;  %s503_s25 = sshll.u32 (!%p155_p3), %s160_s24, 8 }
  0x2a   : > { %s161_s26 = scalar_lea.sflag (!%p155_p3), [#allocation3], %s160_s24  ;;  %s854_s28 = scalar_lea.vmem (!%p155_p3), [#allocation2], %s503_s25 }
  0x30   : > { %727 = dma.done.wait (%p804_p7), %s161_s26, 4096  }
  0x31   : > { %729 = vsyncadd (%p804_p7), %s161_s26, 4294963200  ;;  %v242_v0 = vld [vmem:[%s1062_s1 + $0x80] sm:$0xff]  ;;  %v243_v1 = vld [vmem:[%s1062_s1 + $0x88] sm:$0xff]  ;;  %s504_s30 = sshll.u32 %s494_s16, 4  ;;  %vm410_vm0 = vcmask 261120  }
  0x32   : > { %v226_v2 = vld [vmem:[%s1062_s1] sm:$0xff]  ;;  %v591_v3 = vpack.c.bf16 %v243_v1, %v242_v0  ;;  %v227_v4 = vld [vmem:[%s1062_s1 + $0x8] sm:$0xff]  ;;  %v244_v5 = vld [vmem:[%s1062_s1 + $0x90] sm:$0xff]  ;;  %p189_p7 = scmp.lt.s32.totalorder %s504_s30, 31 }
  0x33   : > { %v245_v6 = vld [vmem:[%s1062_s1 + $0x98] sm:$0xff]  ;;  %v593_v7 = vpack.c.bf16 %v227_v4, %v226_v2  ;;  %v228_v9 = vld [vmem:[%s1062_s1 + $0x10] sm:$0xff]  ;;  %v246_v11 = vld [vmem:[%s1062_s1 + $0xa0] sm:$0xff] }
  0x34   : > { %v595_v8 = vpack.c.bf16 %v245_v6, %v244_v5  ;;  %v229_v10 = vld [vmem:[%s1062_s1 + $0x18] sm:$0xff]  ;;  %592 = vmatprep.subr.bf16.mxu0 %v591_v3  ;;  %623 = vmatprep.subr.bf16.mxu1 %v591_v3  ;;  %v247_v12 = vld [vmem:[%s1062_s1 + $0xa8] sm:$0xff]  ;;  %v230_v15 = vld [vmem:[%s1062_s1 + $0x20] sm:$0xff]  ;;  %s1073_s30 = smov (!%p189_p7, %s504_s30), 31 }
  0x35   : > { %594 = vmatpush3.bf16.msra.mxu0 %v593_v7  ;;  %631 = vmatpush3.bf16.msra.mxu1 %v593_v7  ;;  %v597_v13 = vpack.c.bf16 %v229_v10, %v228_v9  ;;  %v599_v14 = vpack.c.bf16 %v247_v12, %v246_v11  ;;  %v231_v16 = vld [vmem:[%s1062_s1 + $0x28] sm:$0xff]  ;;  %v248_v17 = vld [vmem:[%s1062_s1 + $0xb0] sm:$0xff]  ;;  %v249_v18 = vld [vmem:[%s1062_s1 + $0xb8] sm:$0xff]  ;;  %s505_s4 = sshll.u32 %s1073_s30, 3 }
  0x36   : > { %596 = vmatprep.subr.bf16.mxu0 %v595_v8  ;;  %624 = vmatprep.subr.bf16.mxu1 %v595_v8  ;;  %v601_v19 = vpack.c.bf16 %v231_v16, %v230_v15  ;;  %v603_v20 = vpack.c.bf16 %v249_v18, %v248_v17  ;;  %v232_v21 = vld [vmem:[%s1062_s1 + $0x30] sm:$0xff]  ;;  %v233_v22 = vld [vmem:[%s1062_s1 + $0x38] sm:$0xff]  ;;  %v250_v23 = vld [vmem:[%s1062_s1 + $0xc0] sm:$0xff]  ;;  %s998_s21 = scalar_lea.vmem %s1064_s3, %s505_s4 }
  0x37   : > { %v251_v24 = vld [vmem:[%s1062_s1 + $0xc8] sm:$0xff]  ;;  %v605_v27 = vpack.c.bf16 %v233_v22, %v232_v21  ;;  %v234_v29 = vld [vmem:[%s1062_s1 + $0x40] sm:$0xff]  ;;  %v252_v31 = vld [vmem:[%s1062_s1 + $0xd0] sm:$0xff] }
  0x38   : > { %v195_v25 = vld [vmem:[%s854_s28 + $0x8] sm:$0xff]  ;;  %v607_v28 = vpack.c.bf16 %v251_v24, %v250_v23  ;;  %v253_v32 = vld [vmem:[%s1062_s1 + $0xd8] sm:$0xff]  ;;  %v236_v35 = vld [vmem:[%s1062_s1 + $0x50] sm:$0xff] }
  0x39   : > { %598 = vmatpush3.bf16.msra.mxu0 %v597_v13  ;;  %632 = vmatpush3.bf16.msra.mxu1 %v597_v13  ;;  %v211_v26 = vld [vmem:[%s854_s28 + $0x88] sm:$0xff]  ;;  %v611_v34 = vpack.c.bf16 %v253_v32, %v252_v31  ;;  %v237_v36 = vld [vmem:[%s1062_s1 + $0x58] sm:$0xff]  ;;  %v254_v37 = vld [vmem:[%s1062_s1 + $0xe0] sm:$0xff] }
  0x3a   : > { %600 = vmatprep.subr.bf16.mxu0 %v599_v14  ;;  %625 = vmatprep.subr.bf16.mxu1 %v599_v14  ;;  %v235_v30 = vld [vmem:[%s1062_s1 + $0x48] sm:$0xff]  ;;  %v613_v39 = vpack.c.bf16 %v237_v36, %v236_v35  ;;  %v238_v41 = vld [vmem:[%s1062_s1 + $0x60] sm:$0xff]  ;;  %v256_v43 = vld [vmem:[%s1062_s1 + $0xf0] sm:$0xff] }
  0x3b   : > { %329 = vmatprep.mubr.f32.mxu0 %v195_v25  ;;  %369 = vmatprep.mubr.f32.mxu1 %v211_v26  ;;  %v609_v33 = vpack.c.bf16 %v235_v30, %v234_v29  ;;  %v255_v38 = vld [vmem:[%s1062_s1 + $0xe8] sm:$0xff]  ;;  %v257_v44 = vld [vmem:[%s1062_s1 + $0xf8] sm:$0xff]  ;;  %v240_v47 = vld [vmem:[%s1062_s1 + $0x70] sm:$0xff] }
  0x3c   : > { %v615_v40 = vpack.c.bf16 %v255_v38, %v254_v37  ;;  %v239_v42 = vld [vmem:[%s1062_s1 + $0x68] sm:$0xff]  ;;  %v619_v46 = vpack.c.bf16 %v257_v44, %v256_v43  ;;  %v241_v48 = vld [vmem:[%s1062_s1 + $0x78] sm:$0xff]  ;;  %v194_v50 = vld [vmem:[%s854_s28] sm:$0xff] }
  0x3d   : > { %602 = vmatpush3.bf16.msra.mxu0 %v601_v19  ;;  %633 = vmatpush3.bf16.msra.mxu1 %v601_v19  ;;  %v617_v45 = vpack.c.bf16 %v239_v42, %v238_v41  ;;  %v621_v49 = vpack.c.bf16 %v241_v48, %v240_v47  ;;  %v210_v51 = vld [vmem:[%s854_s28 + $0x80] sm:$0xff]  ;;  %v197_v52 = vld [vmem:[%s854_s28 + $0x18] sm:$0xff]  ;;  %v196_v54 = vld [vmem:[%s854_s28 + $0x10] sm:$0xff] }
  0x3e   : > { %604 = vmatprep.subr.bf16.mxu0 %v603_v20  ;;  %626 = vmatprep.subr.bf16.mxu1 %v603_v20  ;;  %v213_v53 = vld [vmem:[%s854_s28 + $0x98] sm:$0xff]  ;;  %v212_v55 = vld [vmem:[%s854_s28 + $0x90] sm:$0xff]  ;;  %v199_v56 = vld [vmem:[%s854_s28 + $0x28] sm:$0xff] }
  0x3f   : > { %v215_v57 = vld [vmem:[%s854_s28 + $0xa8] sm:$0xff]  ;;  %v198_v58 = vld [vmem:[%s854_s28 + $0x20] sm:$0xff]  ;;  %v201_v60 = vld [vmem:[%s854_s28 + $0x38] sm:$0xff] }
  0x40   : > { %v214_v59 = vld [vmem:[%s854_s28 + $0xa0] sm:$0xff]  ;;  %v217_v61 = vld [vmem:[%s854_s28 + $0xb8] sm:$0xff]  ;;  %v200_v62 = vld [vmem:[%s854_s28 + $0x30] sm:$0xff] }
  0x41   : > { %606 = vmatpush3.bf16.msra.mxu0 %v605_v27  ;;  %634 = vmatpush3.bf16.msra.mxu1 %v605_v27  ;;  %v216_v63 = vld [vmem:[%s854_s28 + $0xb0] sm:$0xff]  ;;  %v203_v0 = vld [vmem:[%s854_s28 + $0x48] sm:$0xff]  ;;  %v202_v2 = vld [vmem:[%s854_s28 + $0x40] sm:$0xff] }
  0x42   : > { %608 = vmatprep.subr.bf16.mxu0 %v607_v28  ;;  %627 = vmatprep.subr.bf16.mxu1 %v607_v28  ;;  %v219_v1 = vld [vmem:[%s854_s28 + $0xc8] sm:$0xff]  ;;  %v218_v3 = vld [vmem:[%s854_s28 + $0xc0] sm:$0xff]  ;;  %v205_v4 = vld [vmem:[%s854_s28 + $0x58] sm:$0xff] }
  0x43   : > { %v221_v5 = vld [vmem:[%s854_s28 + $0xd8] sm:$0xff]  ;;  %v204_v6 = vld [vmem:[%s854_s28 + $0x50] sm:$0xff]  ;;  %v207_v8 = vld [vmem:[%s854_s28 + $0x68] sm:$0xff] }
  0x44   : > { %v220_v7 = vld [vmem:[%s854_s28 + $0xd0] sm:$0xff]  ;;  %v223_v9 = vld [vmem:[%s854_s28 + $0xe8] sm:$0xff]  ;;  %v206_v10 = vld [vmem:[%s854_s28 + $0x60] sm:$0xff] }
  0x45   : > { %610 = vmatpush3.bf16.msra.mxu0 %v609_v33  ;;  %635 = vmatpush3.bf16.msra.mxu1 %v609_v33  ;;  %v222_v11 = vld [vmem:[%s854_s28 + $0xe0] sm:$0xff]  ;;  %v209_v12 = vld [vmem:[%s854_s28 + $0x78] sm:$0xff]  ;;  %v208_v14 = vld [vmem:[%s854_s28 + $0x70] sm:$0xff] }
  0x46   : > { %612 = vmatprep.subr.bf16.mxu0 %v611_v34  ;;  %628 = vmatprep.subr.bf16.mxu1 %v611_v34  ;;  %v225_v13 = vld [vmem:[%s854_s28 + $0xf8] sm:$0xff]  ;;  %v224_v15 = vld [vmem:[%s854_s28 + $0xf0] sm:$0xff]  ;;  %v993_v18 = vld [vmem:[%s1063_s2] ss:$0 sm:$0xff] }
  0x49   : > { %614 = vmatpush3.bf16.msra.mxu0 %v613_v39  ;;  %636 = vmatpush3.bf16.msra.mxu1 %v613_v39 }
  0x4a   : > { %616 = vmatprep.subr.bf16.mxu0 %v615_v40  ;;  %629 = vmatprep.subr.bf16.mxu1 %v615_v40 }
  0x4d   : > { %618 = vmatpush3.bf16.msra.mxu0 %v617_v45  ;;  %637 = vmatpush3.bf16.msra.mxu1 %v617_v45 }
  0x4e   : > { %620 = vmatprep.subr.bf16.mxu0 %v619_v46  ;;  %630 = vmatprep.subr.bf16.mxu1 %v619_v46 }
  0x51   : > { %622 = vmatpush3.bf16.msra.mxu0 %v621_v49  ;;  %638 = vmatpush3.bf16.msra.mxu1 %v621_v49 }
  0x54   : > { %330 = vmatmul.mubr.f32.vlgmr.msra.gmra.mrb[0].mxu0 %v194_v50  ;;  %370 = vmatmul.mubr.f32.vlgmr.msra.gmra.mrb[0].mxu1 %v210_v51 }
  0x55   : > { %334 = vmatprep.mubr.f32.mxu0 %v197_v52  ;;  %374 = vmatprep.mubr.f32.mxu1 %v213_v53 }
  0x58   : > { %335 = vmatmul.mubr.f32.gmra.mrb[2].mxu0 %v196_v54  ;;  %375 = vmatmul.mubr.f32.gmra.mrb[2].mxu1 %v212_v55 }
  0x59   : > { %339 = vmatprep.mubr.f32.mxu0 %v199_v56  ;;  %379 = vmatprep.mubr.f32.mxu1 %v215_v57 }
  0x5c   : > { %340 = vmatmul.mubr.f32.gmra.mrb[4].mxu0 %v198_v58  ;;  %380 = vmatmul.mubr.f32.gmra.mrb[4].mxu1 %v214_v59 }
  0x5d   : > { %344 = vmatprep.mubr.f32.mxu0 %v201_v60  ;;  %384 = vmatprep.mubr.f32.mxu1 %v217_v61 }
  0x60   : > { %345 = vmatmul.mubr.f32.gmra.mrb[6].mxu0 %v200_v62  ;;  %385 = vmatmul.mubr.f32.gmra.mrb[6].mxu1 %v216_v63 }
  0x61   : > { %349 = vmatprep.mubr.f32.mxu0 %v203_v0  ;;  %389 = vmatprep.mubr.f32.mxu1 %v219_v1 }
  0x64   : > { %350 = vmatmul.mubr.f32.gmra.mrb[8].mxu0 %v202_v2  ;;  %390 = vmatmul.mubr.f32.gmra.mrb[8].mxu1 %v218_v3 }
  0x65   : > { %354 = vmatprep.mubr.f32.mxu0 %v205_v4  ;;  %394 = vmatprep.mubr.f32.mxu1 %v221_v5 }
  0x68   : > { %355 = vmatmul.mubr.f32.gmra.mrb[10].mxu0 %v204_v6  ;;  %395 = vmatmul.mubr.f32.gmra.mrb[10].mxu1 %v220_v7 }
  0x69   : > { %359 = vmatprep.mubr.f32.mxu0 %v207_v8  ;;  %399 = vmatprep.mubr.f32.mxu1 %v223_v9 }
  0x6c   : > { %360 = vmatmul.mubr.f32.gmra.mrb[12].mxu0 %v206_v10  ;;  %400 = vmatmul.mubr.f32.gmra.mrb[12].mxu1 %v222_v11 }
  0x6d   : > { %364 = vmatprep.mubr.f32.mxu0 %v209_v12  ;;  %404 = vmatprep.mubr.f32.mxu1 %v225_v13 }
  0x70   : > { %365 = vmatmul.mubr.f32.gmra.mrb[14].mxu0 %v208_v14  ;;  %405 = vmatmul.mubr.f32.gmra.mrb[14].mxu1 %v224_v15 }
 0x127   : > { %v543_v16 = vpop.f32.mrb[0].mxu0  ;;  %v567_v17 = vpop.f32.mrb[0].mxu1 }
 0x128   : > { %v544_v19 = vpop.f32.mrb[1].mxu0  ;;  %v568_v20 = vpop.f32.mrb[1].mxu1 }
 0x129   : > { %v545_v21 = vadd.f32 %v544_v19, %v543_v16  ;;  %v569_v22 = vadd.f32 %v568_v20, %v567_v17 }
 0x12b   : > { %v332_v23 = vadd.f32 %v545_v21, %v993_v18  ;;  %v372_v24 = vadd.f32 %v569_v22, %v993_v18  ;;  %v546_v25 = vpop.f32.mrb[2].mxu0  ;;  %v570_v26 = vpop.f32.mrb[2].mxu1 }
 0x12c   : > { %v547_v27 = vpop.f32.mrb[3].mxu0  ;;  %v571_v28 = vpop.f32.mrb[3].mxu1 }
 0x12d   : > { %411 = vst.msk [vmem:[%s998_s21] sm:$0xff] %vm410_vm0, %v332_v23  ;;  %419 = vst.msk [vmem:[%s998_s21 + $0x40] sm:$0xff] %vm410_vm0, %v372_v24  ;;  %v548_v29 = vadd.f32 %v547_v27, %v546_v25  ;;  %v572_v30 = vadd.f32 %v571_v28, %v570_v26 }
 0x12f   : > { %v337_v31 = vadd.f32 %v548_v29, %v993_v18  ;;  %v377_v32 = vadd.f32 %v572_v30, %v993_v18  ;;  %v549_v33 = vpop.f32.mrb[4].mxu0  ;;  %v573_v34 = vpop.f32.mrb[4].mxu1 }
 0x130   : > { %v550_v35 = vpop.f32.mrb[5].mxu0  ;;  %v574_v36 = vpop.f32.mrb[5].mxu1 }
 0x131   : > { %412 = vst.msk [vmem:[%s998_s21 + $0x8] sm:$0xff] %vm410_vm0, %v337_v31  ;;  %420 = vst.msk [vmem:[%s998_s21 + $0x48] sm:$0xff] %vm410_vm0, %v377_v32  ;;  %v551_v37 = vadd.f32 %v550_v35, %v549_v33  ;;  %v575_v38 = vadd.f32 %v574_v36, %v573_v34 }
 0x133   : > { %v342_v39 = vadd.f32 %v551_v37, %v993_v18  ;;  %v382_v40 = vadd.f32 %v575_v38, %v993_v18  ;;  %v552_v41 = vpop.f32.mrb[6].mxu0  ;;  %v576_v42 = vpop.f32.mrb[6].mxu1 }
 0x134   : > { %v553_v43 = vpop.f32.mrb[7].mxu0  ;;  %v577_v44 = vpop.f32.mrb[7].mxu1 }
 0x135   : > { %413 = vst.msk [vmem:[%s998_s21 + $0x10] sm:$0xff] %vm410_vm0, %v342_v39  ;;  %421 = vst.msk [vmem:[%s998_s21 + $0x50] sm:$0xff] %vm410_vm0, %v382_v40  ;;  %v554_v45 = vadd.f32 %v553_v43, %v552_v41  ;;  %v578_v46 = vadd.f32 %v577_v44, %v576_v42 }
 0x137   : > { %v347_v47 = vadd.f32 %v554_v45, %v993_v18  ;;  %v387_v48 = vadd.f32 %v578_v46, %v993_v18  ;;  %v555_v49 = vpop.f32.mrb[8].mxu0  ;;  %v579_v50 = vpop.f32.mrb[8].mxu1 }
 0x138   : > { %v556_v51 = vpop.f32.mrb[9].mxu0  ;;  %v580_v52 = vpop.f32.mrb[9].mxu1 }
 0x139   : > { %414 = vst.msk [vmem:[%s998_s21 + $0x18] sm:$0xff] %vm410_vm0, %v347_v47  ;;  %422 = vst.msk [vmem:[%s998_s21 + $0x58] sm:$0xff] %vm410_vm0, %v387_v48  ;;  %v557_v53 = vadd.f32 %v556_v51, %v555_v49  ;;  %v581_v54 = vadd.f32 %v580_v52, %v579_v50 }
 0x13b   : > { %v352_v55 = vadd.f32 %v557_v53, %v993_v18  ;;  %v392_v56 = vadd.f32 %v581_v54, %v993_v18  ;;  %v558_v57 = vpop.f32.mrb[10].mxu0  ;;  %v582_v58 = vpop.f32.mrb[10].mxu1 }
 0x13c   : > { %v559_v59 = vpop.f32.mrb[11].mxu0  ;;  %v583_v60 = vpop.f32.mrb[11].mxu1 }
 0x13d   : > { %415 = vst.msk [vmem:[%s998_s21 + $0x20] sm:$0xff] %vm410_vm0, %v352_v55  ;;  %423 = vst.msk [vmem:[%s998_s21 + $0x60] sm:$0xff] %vm410_vm0, %v392_v56  ;;  %v560_v61 = vadd.f32 %v559_v59, %v558_v57  ;;  %v584_v62 = vadd.f32 %v583_v60, %v582_v58 }
 0x13f   : > { %v357_v63 = vadd.f32 %v560_v61, %v993_v18  ;;  %v397_v0 = vadd.f32 %v584_v62, %v993_v18  ;;  %v561_v1 = vpop.f32.mrb[12].mxu0  ;;  %v585_v2 = vpop.f32.mrb[12].mxu1 }
 0x140   : > { %v562_v3 = vpop.f32.mrb[13].mxu0  ;;  %v586_v4 = vpop.f32.mrb[13].mxu1 }
 0x141   : > { %416 = vst.msk [vmem:[%s998_s21 + $0x28] sm:$0xff] %vm410_vm0, %v357_v63  ;;  %424 = vst.msk [vmem:[%s998_s21 + $0x68] sm:$0xff] %vm410_vm0, %v397_v0  ;;  %v563_v5 = vadd.f32 %v562_v3, %v561_v1  ;;  %v587_v6 = vadd.f32 %v586_v4, %v585_v2 }
 0x143   : > { %v362_v7 = vadd.f32 %v563_v5, %v993_v18  ;;  %v402_v8 = vadd.f32 %v587_v6, %v993_v18  ;;  %v564_v9 = vpop.f32.mrb[14].mxu0  ;;  %v588_v10 = vpop.f32.mrb[14].mxu1 }
 0x144   : > { %v565_v11 = vpop.f32.mrb[15].mxu0  ;;  %v589_v12 = vpop.f32.mrb[15].mxu1 }
 0x145   : > { %417 = vst.msk [vmem:[%s998_s21 + $0x30] sm:$0xff] %vm410_vm0, %v362_v7  ;;  %425 = vst.msk [vmem:[%s998_s21 + $0x70] sm:$0xff] %vm410_vm0, %v402_v8  ;;  %v566_v13 = vadd.f32 %v565_v11, %v564_v9  ;;  %v590_v14 = vadd.f32 %v589_v12, %v588_v10 }
 0x147   : > { %v367_v15 = vadd.f32 %v566_v13, %v993_v18  ;;  %v407_v16 = vadd.f32 %v590_v14, %v993_v18 }
 0x149   : > { %418 = vst.msk [vmem:[%s998_s21 + $0x38] sm:$0xff] %vm410_vm0, %v367_v15  ;;  %426 = vst.msk [vmem:[%s998_s21 + $0x78] sm:$0xff] %vm410_vm0, %v407_v16 }
 0x14a PF: > { %p13_p8 = scmp.ge.s32.totalorder %s789_s17, 4   ;;  %s1068_s12 = smov %s736_s13 }
 0x14b   : > { %s1069_s13 = smov %s740_s14  ;;  %s1070_s14 = smov %s799_s20 }
 0x14c   : > { %s1071_s15 = smov %s789_s17  ;;  %15 = sbr.rel (!%p13_p8) target bundleno = 3 (0x3), region = 72 }
 0x153   :  { %449 = vsyncpa [#allocation3], 1 }
 0x154   :  { %451 = vsyncpa [#allocation3 + $0x1], 1 }

</bundles_post_ra>
